<compile_context>
chip_gen: v6e
topology: v6e:2x2x1
jax: 0.10.0
libtpu: 0.0.40
codegen_flags: <defaults>
</compile_context>

<pallas_src>
import functools

import jax
import jax.numpy as jnp
from jax import lax
from jax.experimental import pallas as pl
from jax.experimental.pallas import tpu as pltpu

VOCAB = 10
EMB = 32
HIDDEN = 64   # RNN input = 2*EMB = 64, hidden = 64
OUT = 10
VPAD = 16     # one-hot / folded-table rows padded to a sublane multiple
OUTP = 128    # dense output padded to a full lane group (lane-dense stores)


def rnn_fused_kernel(idx1_ref, idx2_ref, a1_ref, a2_ref, whh_t_ref, b_ref,
                     wd_t_ref, bd_ref, y_ref, hs_ref, *, seq_len, batch_block):
    # idx1_ref/idx2_ref: (S, Bb, 1) int32 digit indices (time-major)
    # a1_ref/a2_ref:     (VPAD, 64)  emb @ W_ih[:, :32].T / emb @ W_ih[:, 32:].T
    # whh_t_ref:         (64, 64)    W_hh^T
    # b_ref:             (1, 64)     b_ih + b_hh
    # wd_t_ref:          (64, 128)   W_dense^T zero-padded to 128 lanes
    # bd_ref:            (1, 128)    b_dense zero-padded
    # y_ref:             (S, Bb, 128) output block (lane-dense)
    # hs_ref:            (S*Bb, 64)  VMEM scratch: input projection, then hidden states
    S, Bb = seq_len, batch_block

    # --- Fused embedding gather + input projection (one batched MXU pass). ---
    iota_v = lax.broadcasted_iota(jnp.int32, (S, Bb, VPAD), 2)
    oh1 = (idx1_ref[...] == iota_v).astype(jnp.float32).reshape(S * Bb, VPAD)
    oh2 = (idx2_ref[...] == iota_v).astype(jnp.float32).reshape(S * Bb, VPAD)
    xp = (jnp.dot(oh1, a1_ref[...], preferred_element_type=jnp.float32)
          + jnp.dot(oh2, a2_ref[...], preferred_element_type=jnp.float32)
          + b_ref[...])                                   # (S*Bb, 64)
    hs_ref[...] = xp          # route through VMEM (bounds vreg pressure)

    whh_t = whh_t_ref[...]    # hoist recurrent weight load out of the loop

    # --- Sequential recurrence. ---
    h = jnp.zeros((Bb, HIDDEN), jnp.float32)
    if seq_len <= 16:
        for t in range(seq_len):
            lo = t * Bb
            h = jnp.tanh(hs_ref[lo:lo + Bb, :]
                         + jnp.dot(h, whh_t, preferred_element_type=jnp.float32))
            hs_ref[lo:lo + Bb, :] = h
    else:
        def step(t, h):
            lo = pl.multiple_of(t * Bb, 8)
            h = jnp.tanh(hs_ref[pl.ds(lo, Bb), :]
                         + jnp.dot(h, whh_t, preferred_element_type=jnp.float32))
            hs_ref[pl.ds(lo, Bb), :] = h
            return h
        h = lax.fori_loop(0, seq_len, step, h, unroll=2)

    # --- Dense head: one batched MXU pass, lane-dense (128-wide) store. ---
    y = (jnp.dot(hs_ref[...], wd_t_ref[...], preferred_element_type=jnp.float32)
         + bd_ref[...])                                   # (S*Bb, 128)
    y_ref[...] = y.reshape(S, Bb, OUTP).astype(y_ref.dtype)


def my_pt_rnn_forward(num1, num2, params):
    emb, w_ih, w_hh, b_ih, b_hh, w_d, b_d = params
    B, S = num1.shape
    f32 = jnp.float32

    # Batch padding / tiling: pad to a multiple of 8; tile at 256 rows per core.
    Bp = max(8, ((B + 7) // 8) * 8)
    if Bp <= 256:
        Bb = Bp
    else:
        Bb = 256
        Bp = ((Bp + Bb - 1) // Bb) * Bb

    def prep_idx(idx):
        t = jnp.transpose(idx.astype(jnp.int32), (1, 0))   # (S, B) time-major
        t = jnp.pad(t, ((0, 0), (0, Bp - B)))               # padded rows -> index 0
        return t[..., None]                                  # (S, Bp, 1)

    idx1 = prep_idx(num1)
    idx2 = prep_idx(num2)

    # Fold embedding into the input projection; pre-transpose / pre-pad weights.
    a1 = jnp.zeros((VPAD, HIDDEN), f32).at[:VOCAB].set(emb @ w_ih[:, :EMB].T)
    a2 = jnp.zeros((VPAD, HIDDEN), f32).at[:VOCAB].set(emb @ w_ih[:, EMB:].T)
    b = (b_ih + b_hh).reshape(1, HIDDEN)
    whh_t = w_hh.T
    wd_t = jnp.zeros((HIDDEN, OUTP), f32).at[:, :OUT].set(w_d.T)
    bd = jnp.zeros((1, OUTP), f32).at[:, :OUT].set(b_d.reshape(1, OUT))

    kernel = functools.partial(rnn_fused_kernel, seq_len=S, batch_block=Bb)

    y = pl.pallas_call(
        kernel,
        out_shape=jax.ShapeDtypeStruct((S, Bp, OUTP), f32),
        grid=(Bp // Bb,),                                  # batch blocks
        in_specs=[
            pl.BlockSpec((S, Bb, 1), lambda j: (0, j, 0)),
            pl.BlockSpec((S, Bb, 1), lambda j: (0, j, 0)),
            pl.BlockSpec((VPAD, HIDDEN), lambda j: (0, 0)),
            pl.BlockSpec((VPAD, HIDDEN), lambda j: (0, 0)),
            pl.BlockSpec((HIDDEN, HIDDEN), lambda j: (0, 0)),
            pl.BlockSpec((1, HIDDEN), lambda j: (0, 0)),
            pl.BlockSpec((HIDDEN, OUTP), lambda j: (0, 0)),
            pl.BlockSpec((1, OUTP), lambda j: (0, 0)),
        ],
        out_specs=pl.BlockSpec((S, Bb, OUTP), lambda j: (0, j, 0)),
        scratch_shapes=[pltpu.VMEM((S * Bb, HIDDEN), f32)],
        compiler_params=pltpu.CompilerParams(
            dimension_semantics=("parallel",)),            # batch is independent
    )(idx1, idx2, a1, a2, whh_t, b, wd_t, bd)

    y = y[:, :B, :OUT]                                     # drop batch/lane padding
    return jnp.transpose(y, (1, 0, 2))                     # (B, S, 10)


def reference_forward(num1, num2, params):
    """Pure-JAX reference replicating the PyTorch forward."""
    emb, w_ih, w_hh, b_ih, b_hh, w_d, b_d = params
    x1 = jnp.take(emb, num1, axis=0)
    x2 = jnp.take(emb, num2, axis=0)
    x = jnp.concatenate([x1, x2], axis=-1)             # (B, S, 64)
    x = jnp.transpose(x, (1, 0, 2))                     # (S, B, 64)

    def step(h, x_t):
        h_new = jnp.tanh(x_t @ w_ih.T + b_ih + h @ w_hh.T + b_hh)
        return h_new, h_new

    h0 = jnp.zeros((x.shape[1], HIDDEN), jnp.float32)
    _, hs = jax.lax.scan(step, h0, x)                   # (S, B, 64)
    y = hs @ w_d.T + b_d                                # (S, B, 10)
    return jnp.transpose(y, (1, 0, 2))                  # (B, S, 10)


def init_params(key):
    ks = jax.random.split(key, 7)
    bound = 1.0 / (HIDDEN ** 0.5)
    emb = jax.random.normal(ks[0], (VOCAB, EMB), jnp.float32)
    w_ih = jax.random.uniform(ks[1], (HIDDEN, HIDDEN), jnp.float32, -bound, bound)
    w_hh = jax.random.uniform(ks[2], (HIDDEN, HIDDEN), jnp.float32, -bound, bound)
    b_ih = jax.random.uniform(ks[3], (HIDDEN,), jnp.float32, -bound, bound)
    b_hh = jax.random.uniform(ks[4], (HIDDEN,), jnp.float32, -bound, bound)
    w_d = jax.random.uniform(ks[5], (OUT, HIDDEN), jnp.float32, -bound, bound)
    b_d = jax.random.uniform(ks[6], (OUT,), jnp.float32, -bound, bound)
    return emb, w_ih, w_hh, b_ih, b_hh, w_d, b_d


if __name__ == "__main__":
    key = jax.random.PRNGKey(0)
    k_in1, k_in2, k_params = jax.random.split(key, 3)

    B, S = 2, 8  # small shapes: batch=2, sequence length=8, digits 0..9
    num1 = jax.random.randint(k_in1, (B, S), 0, VOCAB, dtype=jnp.int32)
    num2 = jax.random.randint(k_in2, (B, S), 0, VOCAB, dtype=jnp.int32)
    params = init_params(k_params)

    y = jax.block_until_ready(my_pt_rnn_forward(num1, num2, params))
    y_ref = jax.block_until_ready(reference_forward(num1, num2, params))

    assert y.shape == (B, S, OUT)
    assert jnp.allclose(y, y_ref, atol=1e-5, rtol=1e-5)

    print("KERNEL_OK")
</pallas_src>

<mosaic_0001>
module attributes {stable_mosaic.version = 11 : i64} {
  func.func @rnn_fused_kernel(%arg0: i32, %arg1: memref<8x8x1xi32, #tpu.memory_space<vmem>>, %arg2: memref<8x8x1xi32, #tpu.memory_space<vmem>>, %arg3: memref<16x64xf32, #tpu.memory_space<vmem>>, %arg4: memref<16x64xf32, #tpu.memory_space<vmem>>, %arg5: memref<64x64xf32, #tpu.memory_space<vmem>>, %arg6: memref<1x64xf32, #tpu.memory_space<vmem>>, %arg7: memref<64x128xf32, #tpu.memory_space<vmem>>, %arg8: memref<1x128xf32, #tpu.memory_space<vmem>>, %arg9: memref<8x8x128xf32, #tpu.memory_space<vmem>>, %arg10: memref<64x64xf32, #tpu.memory_space<vmem>>) attributes {dimension_semantics = [#tpu.dimension_semantics<parallel>], iteration_bounds = array<i64: 1>, scalar_prefetch = 0 : i64, scratch_operands = 1 : i64, tpu.core_type = #tpu.core_type<tc>, window_params = [{transform_indices = @transform_0, window_bounds = array<i64: 8, 8, 1>}, {transform_indices = @transform_1, window_bounds = array<i64: 8, 8, 1>}, {pipeline_mode = #tpu.pipeline_mode<synchronous>, transform_indices = @transform_2, window_bounds = array<i64: 16, 64>}, {pipeline_mode = #tpu.pipeline_mode<synchronous>, transform_indices = @transform_3, window_bounds = array<i64: 16, 64>}, {pipeline_mode = #tpu.pipeline_mode<synchronous>, transform_indices = @transform_4, window_bounds = array<i64: 64, 64>}, {pipeline_mode = #tpu.pipeline_mode<synchronous>, transform_indices = @transform_5, window_bounds = array<i64: 1, 64>}, {pipeline_mode = #tpu.pipeline_mode<synchronous>, transform_indices = @transform_6, window_bounds = array<i64: 64, 128>}, {pipeline_mode = #tpu.pipeline_mode<synchronous>, transform_indices = @transform_7, window_bounds = array<i64: 1, 128>}, {transform_indices = @transform_8, window_bounds = array<i64: 8, 8, 128>}]} {
    %0 = tpu.iota {dimensions = array<i32: 2>} : vector<8x8x16xi32>
    %c0 = arith.constant 0 : index
    %c0_0 = arith.constant 0 : index
    %c0_1 = arith.constant 0 : index
    %1 = vector.load %arg1[%c0, %c0_0, %c0_1] : memref<8x8x1xi32, #tpu.memory_space<vmem>>, vector<8x8x1xi32>
    %2 = vector.broadcast %1 : vector<8x8x1xi32> to vector<8x8x16xi32>
    %3 = arith.cmpi eq, %2, %0 : vector<8x8x16xi32>
    %4 = arith.extui %3 : vector<8x8x16xi1> to vector<8x8x16xi32>
    %5 = arith.sitofp %4 : vector<8x8x16xi32> to vector<8x8x16xf32>
    %6 = vector.shape_cast %5 : vector<8x8x16xf32> to vector<64x16xf32>
    %c0_2 = arith.constant 0 : index
    %c0_3 = arith.constant 0 : index
    %c0_4 = arith.constant 0 : index
    %7 = vector.load %arg2[%c0_2, %c0_3, %c0_4] : memref<8x8x1xi32, #tpu.memory_space<vmem>>, vector<8x8x1xi32>
    %8 = vector.broadcast %7 : vector<8x8x1xi32> to vector<8x8x16xi32>
    %9 = arith.cmpi eq, %8, %0 : vector<8x8x16xi32>
    %10 = arith.extui %9 : vector<8x8x16xi1> to vector<8x8x16xi32>
    %11 = arith.sitofp %10 : vector<8x8x16xi32> to vector<8x8x16xf32>
    %12 = vector.shape_cast %11 : vector<8x8x16xf32> to vector<64x16xf32>
    %c0_5 = arith.constant 0 : index
    %c0_6 = arith.constant 0 : index
    %13 = vector.load %arg3[%c0_5, %c0_6] : memref<16x64xf32, #tpu.memory_space<vmem>>, vector<16x64xf32>
    %cst = arith.constant dense<0.000000e+00> : vector<64x64xf32>
    %14 = tpu.matmul %6, %13, %cst {dimension_numbers = #tpu.dot_dimension_numbers<[1], [0], [0], [1], [0, 0, 1, 1], [], []>} : vector<64x16xf32>, vector<16x64xf32>, vector<64x64xf32> -> vector<64x64xf32>
    %c0_7 = arith.constant 0 : index
    %c0_8 = arith.constant 0 : index
    %15 = vector.load %arg4[%c0_7, %c0_8] : memref<16x64xf32, #tpu.memory_space<vmem>>, vector<16x64xf32>
    %cst_9 = arith.constant dense<0.000000e+00> : vector<64x64xf32>
    %16 = tpu.matmul %12, %15, %cst_9 {dimension_numbers = #tpu.dot_dimension_numbers<[1], [0], [0], [1], [0, 0, 1, 1], [], []>} : vector<64x16xf32>, vector<16x64xf32>, vector<64x64xf32> -> vector<64x64xf32>
    %17 = arith.addf %14, %16 : vector<64x64xf32>
    %c0_10 = arith.constant 0 : index
    %c0_11 = arith.constant 0 : index
    %18 = vector.load %arg6[%c0_10, %c0_11] : memref<1x64xf32, #tpu.memory_space<vmem>>, vector<1x64xf32>
    %19 = vector.broadcast %18 : vector<1x64xf32> to vector<64x64xf32>
    %20 = arith.addf %17, %19 : vector<64x64xf32>
    %c0_12 = arith.constant 0 : index
    %c0_13 = arith.constant 0 : index
    %21 = vector.load %arg10[%c0_12, %c0_13] : memref<64x64xf32, #tpu.memory_space<vmem>>, vector<64x64xf32>
    tpu.vector_store %arg10[%c0_12, %c0_13], %20 {strides = array<i32>} : memref<64x64xf32, #tpu.memory_space<vmem>>, vector<64x64xf32>,
    %c0_14 = arith.constant 0 : index
    %c0_15 = arith.constant 0 : index
    %22 = vector.load %arg5[%c0_14, %c0_15] : memref<64x64xf32, #tpu.memory_space<vmem>>, vector<64x64xf32>
    %cst_16 = arith.constant 0.000000e+00 : f32
    %23 = vector.broadcast %cst_16 : f32 to vector<8x64xf32>
    %c0_17 = arith.constant 0 : index
    %c0_18 = arith.constant 0 : index
    %24 = vector.load %arg10[%c0_17, %c0_18] : memref<64x64xf32, #tpu.memory_space<vmem>>, vector<8x64xf32>
    %cst_19 = arith.constant dense<0.000000e+00> : vector<8x64xf32>
    %25 = tpu.matmul %23, %22, %cst_19 {dimension_numbers = #tpu.dot_dimension_numbers<[1], [0], [0], [1], [0, 0, 1, 1], [], []>} : vector<8x64xf32>, vector<64x64xf32>, vector<8x64xf32> -> vector<8x64xf32>
    %26 = arith.addf %24, %25 : vector<8x64xf32>
    %27 = math.tanh %26 : vector<8x64xf32>
    %c0_20 = arith.constant 0 : index
    %c0_21 = arith.constant 0 : index
    %28 = vector.load %arg10[%c0_20, %c0_21] : memref<64x64xf32, #tpu.memory_space<vmem>>, vector<8x64xf32>
    tpu.vector_store %arg10[%c0_20, %c0_21], %27 {strides = array<i32>} : memref<64x64xf32, #tpu.memory_space<vmem>>, vector<8x64xf32>,
    %c8 = arith.constant 8 : index
    %c0_22 = arith.constant 0 : index
    %29 = vector.load %arg10[%c8, %c0_22] : memref<64x64xf32, #tpu.memory_space<vmem>>, vector<8x64xf32>
    %cst_23 = arith.constant dense<0.000000e+00> : vector<8x64xf32>
    %30 = tpu.matmul %27, %22, %cst_23 {dimension_numbers = #tpu.dot_dimension_numbers<[1], [0], [0], [1], [0, 0, 1, 1], [], []>} : vector<8x64xf32>, vector<64x64xf32>, vector<8x64xf32> -> vector<8x64xf32>
    %31 = arith.addf %29, %30 : vector<8x64xf32>
    %32 = math.tanh %31 : vector<8x64xf32>
    %c8_24 = arith.constant 8 : index
    %c0_25 = arith.constant 0 : index
    %33 = vector.load %arg10[%c8_24, %c0_25] : memref<64x64xf32, #tpu.memory_space<vmem>>, vector<8x64xf32>
    tpu.vector_store %arg10[%c8_24, %c0_25], %32 {strides = array<i32>} : memref<64x64xf32, #tpu.memory_space<vmem>>, vector<8x64xf32>,
    %c16 = arith.constant 16 : index
    %c0_26 = arith.constant 0 : index
    %34 = vector.load %arg10[%c16, %c0_26] : memref<64x64xf32, #tpu.memory_space<vmem>>, vector<8x64xf32>
    %cst_27 = arith.constant dense<0.000000e+00> : vector<8x64xf32>
    %35 = tpu.matmul %32, %22, %cst_27 {dimension_numbers = #tpu.dot_dimension_numbers<[1], [0], [0], [1], [0, 0, 1, 1], [], []>} : vector<8x64xf32>, vector<64x64xf32>, vector<8x64xf32> -> vector<8x64xf32>
    %36 = arith.addf %34, %35 : vector<8x64xf32>
    %37 = math.tanh %36 : vector<8x64xf32>
    %c16_28 = arith.constant 16 : index
    %c0_29 = arith.constant 0 : index
    %38 = vector.load %arg10[%c16_28, %c0_29] : memref<64x64xf32, #tpu.memory_space<vmem>>, vector<8x64xf32>
    tpu.vector_store %arg10[%c16_28, %c0_29], %37 {strides = array<i32>} : memref<64x64xf32, #tpu.memory_space<vmem>>, vector<8x64xf32>,
    %c24 = arith.constant 24 : index
    %c0_30 = arith.constant 0 : index
    %39 = vector.load %arg10[%c24, %c0_30] : memref<64x64xf32, #tpu.memory_space<vmem>>, vector<8x64xf32>
    %cst_31 = arith.constant dense<0.000000e+00> : vector<8x64xf32>
    %40 = tpu.matmul %37, %22, %cst_31 {dimension_numbers = #tpu.dot_dimension_numbers<[1], [0], [0], [1], [0, 0, 1, 1], [], []>} : vector<8x64xf32>, vector<64x64xf32>, vector<8x64xf32> -> vector<8x64xf32>
    %41 = arith.addf %39, %40 : vector<8x64xf32>
    %42 = math.tanh %41 : vector<8x64xf32>
    %c24_32 = arith.constant 24 : index
    %c0_33 = arith.constant 0 : index
    %43 = vector.load %arg10[%c24_32, %c0_33] : memref<64x64xf32, #tpu.memory_space<vmem>>, vector<8x64xf32>
    tpu.vector_store %arg10[%c24_32, %c0_33], %42 {strides = array<i32>} : memref<64x64xf32, #tpu.memory_space<vmem>>, vector<8x64xf32>,
    %c32 = arith.constant 32 : index
    %c0_34 = arith.constant 0 : index
    %44 = vector.load %arg10[%c32, %c0_34] : memref<64x64xf32, #tpu.memory_space<vmem>>, vector<8x64xf32>
    %cst_35 = arith.constant dense<0.000000e+00> : vector<8x64xf32>
    %45 = tpu.matmul %42, %22, %cst_35 {dimension_numbers = #tpu.dot_dimension_numbers<[1], [0], [0], [1], [0, 0, 1, 1], [], []>} : vector<8x64xf32>, vector<64x64xf32>, vector<8x64xf32> -> vector<8x64xf32>
    %46 = arith.addf %44, %45 : vector<8x64xf32>
    %47 = math.tanh %46 : vector<8x64xf32>
    %c32_36 = arith.constant 32 : index
    %c0_37 = arith.constant 0 : index
    %48 = vector.load %arg10[%c32_36, %c0_37] : memref<64x64xf32, #tpu.memory_space<vmem>>, vector<8x64xf32>
    tpu.vector_store %arg10[%c32_36, %c0_37], %47 {strides = array<i32>} : memref<64x64xf32, #tpu.memory_space<vmem>>, vector<8x64xf32>,
    %c40 = arith.constant 40 : index
    %c0_38 = arith.constant 0 : index
    %49 = vector.load %arg10[%c40, %c0_38] : memref<64x64xf32, #tpu.memory_space<vmem>>, vector<8x64xf32>
    %cst_39 = arith.constant dense<0.000000e+00> : vector<8x64xf32>
    %50 = tpu.matmul %47, %22, %cst_39 {dimension_numbers = #tpu.dot_dimension_numbers<[1], [0], [0], [1], [0, 0, 1, 1], [], []>} : vector<8x64xf32>, vector<64x64xf32>, vector<8x64xf32> -> vector<8x64xf32>
    %51 = arith.addf %49, %50 : vector<8x64xf32>
    %52 = math.tanh %51 : vector<8x64xf32>
    %c40_40 = arith.constant 40 : index
    %c0_41 = arith.constant 0 : index
    %53 = vector.load %arg10[%c40_40, %c0_41] : memref<64x64xf32, #tpu.memory_space<vmem>>, vector<8x64xf32>
    tpu.vector_store %arg10[%c40_40, %c0_41], %52 {strides = array<i32>} : memref<64x64xf32, #tpu.memory_space<vmem>>, vector<8x64xf32>,
    %c48 = arith.constant 48 : index
    %c0_42 = arith.constant 0 : index
    %54 = vector.load %arg10[%c48, %c0_42] : memref<64x64xf32, #tpu.memory_space<vmem>>, vector<8x64xf32>
    %cst_43 = arith.constant dense<0.000000e+00> : vector<8x64xf32>
    %55 = tpu.matmul %52, %22, %cst_43 {dimension_numbers = #tpu.dot_dimension_numbers<[1], [0], [0], [1], [0, 0, 1, 1], [], []>} : vector<8x64xf32>, vector<64x64xf32>, vector<8x64xf32> -> vector<8x64xf32>
    %56 = arith.addf %54, %55 : vector<8x64xf32>
    %57 = math.tanh %56 : vector<8x64xf32>
    %c48_44 = arith.constant 48 : index
    %c0_45 = arith.constant 0 : index
    %58 = vector.load %arg10[%c48_44, %c0_45] : memref<64x64xf32, #tpu.memory_space<vmem>>, vector<8x64xf32>
    tpu.vector_store %arg10[%c48_44, %c0_45], %57 {strides = array<i32>} : memref<64x64xf32, #tpu.memory_space<vmem>>, vector<8x64xf32>,
    %c56 = arith.constant 56 : index
    %c0_46 = arith.constant 0 : index
    %59 = vector.load %arg10[%c56, %c0_46] : memref<64x64xf32, #tpu.memory_space<vmem>>, vector<8x64xf32>
    %cst_47 = arith.constant dense<0.000000e+00> : vector<8x64xf32>
    %60 = tpu.matmul %57, %22, %cst_47 {dimension_numbers = #tpu.dot_dimension_numbers<[1], [0], [0], [1], [0, 0, 1, 1], [], []>} : vector<8x64xf32>, vector<64x64xf32>, vector<8x64xf32> -> vector<8x64xf32>
    %61 = arith.addf %59, %60 : vector<8x64xf32>
    %62 = math.tanh %61 : vector<8x64xf32>
    %c56_48 = arith.constant 56 : index
    %c0_49 = arith.constant 0 : index
    %63 = vector.load %arg10[%c56_48, %c0_49] : memref<64x64xf32, #tpu.memory_space<vmem>>, vector<8x64xf32>
    tpu.vector_store %arg10[%c56_48, %c0_49], %62 {strides = array<i32>} : memref<64x64xf32, #tpu.memory_space<vmem>>, vector<8x64xf32>,
    %c0_50 = arith.constant 0 : index
    %c0_51 = arith.constant 0 : index
    %64 = vector.load %arg10[%c0_50, %c0_51] : memref<64x64xf32, #tpu.memory_space<vmem>>, vector<64x64xf32>
    %c0_52 = arith.constant 0 : index
    %c0_53 = arith.constant 0 : index
    %65 = vector.load %arg7[%c0_52, %c0_53] : memref<64x128xf32, #tpu.memory_space<vmem>>, vector<64x128xf32>
    %cst_54 = arith.constant dense<0.000000e+00> : vector<64x128xf32>
    %66 = tpu.matmul %64, %65, %cst_54 {dimension_numbers = #tpu.dot_dimension_numbers<[1], [0], [0], [1], [0, 0, 1, 1], [], []>} : vector<64x64xf32>, vector<64x128xf32>, vector<64x128xf32> -> vector<64x128xf32>
    %c0_55 = arith.constant 0 : index
    %c0_56 = arith.constant 0 : index
    %67 = vector.load %arg8[%c0_55, %c0_56] : memref<1x128xf32, #tpu.memory_space<vmem>>, vector<1x128xf32>
    %68 = vector.broadcast %67 : vector<1x128xf32> to vector<64x128xf32>
    %69 = arith.addf %66, %68 : vector<64x128xf32>
    %70 = vector.shape_cast %69 : vector<64x128xf32> to vector<8x8x128xf32>
    %c0_57 = arith.constant 0 : index
    %c0_58 = arith.constant 0 : index
    %c0_59 = arith.constant 0 : index
    %71 = vector.load %arg9[%c0_57, %c0_58, %c0_59] : memref<8x8x128xf32, #tpu.memory_space<vmem>>, vector<8x8x128xf32>
    tpu.vector_store %arg9[%c0_57, %c0_58, %c0_59], %70 {strides = array<i32>} : memref<8x8x128xf32, #tpu.memory_space<vmem>>, vector<8x8x128xf32>,
    return
  }
  func.func @transform_0(%arg0: i32) -> (i32, i32, i32) {
    %c0_i32 = arith.constant 0 : i32
    %c0_i32_0 = arith.constant 0 : i32
    %c0_i32_1 = arith.constant 0 : i32
    return %c0_i32, %arg0, %c0_i32_0 : i32, i32, i32
  }
  func.func @transform_1(%arg0: i32) -> (i32, i32, i32) {
    %c0_i32 = arith.constant 0 : i32
    %c0_i32_0 = arith.constant 0 : i32
    %c0_i32_1 = arith.constant 0 : i32
    return %c0_i32, %arg0, %c0_i32_0 : i32, i32, i32
  }
  func.func @transform_2(%arg0: i32) -> (i32, i32) {
    %c0_i32 = arith.constant 0 : i32
    %c0_i32_0 = arith.constant 0 : i32
    %c0_i32_1 = arith.constant 0 : i32
    return %c0_i32, %c0_i32_0 : i32, i32
  }
  func.func @transform_3(%arg0: i32) -> (i32, i32) {
    %c0_i32 = arith.constant 0 : i32
    %c0_i32_0 = arith.constant 0 : i32
    %c0_i32_1 = arith.constant 0 : i32
    return %c0_i32, %c0_i32_0 : i32, i32
  }
  func.func @transform_4(%arg0: i32) -> (i32, i32) {
    %c0_i32 = arith.constant 0 : i32
    %c0_i32_0 = arith.constant 0 : i32
    %c0_i32_1 = arith.constant 0 : i32
    return %c0_i32, %c0_i32_0 : i32, i32
  }
  func.func @transform_5(%arg0: i32) -> (i32, i32) {
    %c0_i32 = arith.constant 0 : i32
    %c0_i32_0 = arith.constant 0 : i32
    %c0_i32_1 = arith.constant 0 : i32
    return %c0_i32, %c0_i32_0 : i32, i32
  }
  func.func @transform_6(%arg0: i32) -> (i32, i32) {
    %c0_i32 = arith.constant 0 : i32
    %c0_i32_0 = arith.constant 0 : i32
    %c0_i32_1 = arith.constant 0 : i32
    return %c0_i32, %c0_i32_0 : i32, i32
  }
  func.func @transform_7(%arg0: i32) -> (i32, i32) {
    %c0_i32 = arith.constant 0 : i32
    %c0_i32_0 = arith.constant 0 : i32
    %c0_i32_1 = arith.constant 0 : i32
    return %c0_i32, %c0_i32_0 : i32, i32
  }
  func.func @transform_8(%arg0: i32) -> (i32, i32, i32) {
    %c0_i32 = arith.constant 0 : i32
    %c0_i32_0 = arith.constant 0 : i32
    %c0_i32_1 = arith.constant 0 : i32
    return %c0_i32, %arg0, %c0_i32_0 : i32, i32, i32
  }
}

</mosaic_0001>

<bundles_post_ra>
// kernel: tpu_custom_call.1
= control target key start
LH: loop header
LB: loop body
LE: loop exit
PB: predicated region body
PF: predicated region fallthrough
CT: control target
= control target key end

     0   :  { %13 = vsyncpa [#allocation4], 0  ;;  %s2098_s0 = inlined_call_operand.vmem [shape: s32[8,8,1], index: 0, kind: input, shape index: {}]   ;;  %s2099_s1 = inlined_call_operand.vmem [shape: s32[8,8,1], index: 1, kind: input, shape index: {}]   ;;  %s2100_s2 = inlined_call_operand.vmem [shape: f32[16,64], index: 2, kind: input, shape index: {}]   ;;  %s2101_s3 = inlined_call_operand.hbm [shape: f32[16,64], index: 3, kind: input, shape index: {}]   ;;  %s2102_s4 = inlined_call_operand.vmem [shape: f32[64,64], index: 4, kind: input, shape index: {}]   ;;  %s2103_s5 = inlined_call_operand.vmem [shape: f32[1,64], index: 5, kind: input, shape index: {}]   ;;  %s2104_s6 = inlined_call_operand.vmem [shape: f32[64,128], index: 6, kind: input, shape index: {}]   ;;  %s2105_s7 = inlined_call_operand.vmem [shape: f32[1,128], index: 7, kind: input, shape index: {}]   ;;  %s2106_s8 = inlined_call_operand.hbm [shape: f32[8,8,128], index: 8, kind: output, shape index: {}]  }
   0x1   :  { %14 = vsyncpa [#allocation5], 0  ;;  %s1684_s27 = smov [#allocation3]  }
   0x2   :  { %s26_s28 = sshll.u32 %s1684_s27, 4  ;;  %s27_s28 = int_to_ptr.vmem [resolvable:$true] %s26_s28 }
   0x3   :  { %s1648_s29 = scalar_lea.vmem %s27_s28, 256  ;;  %p1653_p1 = scmp.lt.s32.totalorder %s27_s28, %s27_s28 }
   0x4   :  { %p1649_p0 = scmp.ne.s32.totalorder %s27_s28, %s1648_s29  ;;  %p1654_p2 = scmp.lt.s32.totalorder %s1648_s29, %s1648_s29 }
   0x6   :  { %p1655_p3 = por %p1654_p2, %p1653_p1 }
   0x8   :  { %p1656_p4 = pnand %p1655_p3, %p1649_p0 }
   0xa   :  { %1659 = shalt.err (!%p1656_p4)
}
   0xb   :  { %s1685_s30 = smov 128   ;;  %s1686_s9 = smov 8  }
   0xc   :  { %32 = dma.hbm_to_vmem [thread:$0]  %s2101_s3, 256, %s27_s28, [#allocation4], %s1685_s30, %s1685_s30, %s1686_s9  }
   0xd   :  { %1680 = dma.done.wait [#allocation4], 256  }
   0xe   :  { %1681 = vsyncadd [#allocation4], 4294967040  ;;  %v1687_v0 = vmov 0   ;;  %v102_v1 = vld [vmem:[%s2099_s1] sm:$0xff]  ;;  %v103_v3 = vld [vmem:[%s2099_s1 + $0x8] sm:$0xff]  ;;  %v1688_v13 = vmov 0.0   ;;  %v44_v22 = vlaneseq }
   0xf   :  { %1623 = vset.pattern.permute.xlu1 %v1687_v0  ;;  %1622 = vset.pattern.permute.xlu0 %v1687_v0  ;;  %v46_v2 = vld [vmem:[%s2098_s0] sm:$0xff]  ;;  %v47_v4 = vld [vmem:[%s2098_s0 + $0x8] sm:$0xff]  ;;  %v49_v5 = vld [vmem:[%s2098_s0 + $0x18] sm:$0xff]  ;;  %vm162_vm0 = vcmask 130048   ;;  %vm1689_vm13 = vmmov 0  }
  0x10   :  { %111 = vperm.xlu1 %1623, %v102_v1   ;;  %55 = vperm.xlu0 %1622, %v46_v2   ;;  %v161_v6 = vld [vmem:[#allocation3 + $0x8] sm:$0xff]  ;;  %v48_v8 = vld [vmem:[%s2098_s0 + $0x10] sm:$0xff]  ;;  %v160_v9 = vld [vmem:[#allocation3] sm:$0xff]  ;;  %v1798_v23 = vand.u32 127, %v44_v22 }
  0x11   :  { %v159_v7 = vld [vmem:[%s2100_s2 + $0x8] sm:$0xff]  ;;  %1403 = vmatprep.subr.mxu0 %v161_v6  ;;  %v158_v10 = vld [vmem:[%s2100_s2] sm:$0xff]  ;;  %v53_v14 = vld [vmem:[%s2098_s0 + $0x38] sm:$0xff] }
  0x12   :  { %1419 = vmatprep.subr.mxu1 %v159_v7  ;;  %1404 = vmatpush3.msra.mxu0 %v161_v6  ;;  %v51_v11 = vld [vmem:[%s2098_s0 + $0x28] sm:$0xff]  ;;  %v50_v12 = vld [vmem:[%s2098_s0 + $0x20] sm:$0xff]  ;;  %v52_v15 = vld [vmem:[%s2098_s0 + $0x30] sm:$0xff] }
  0x13   :  { %1420 = vmatpush3.msra.mxu1 %v159_v7  ;;  %1405 = vmatprep.subr.mxu0 %v160_v9  ;;  %v105_v16 = vld [vmem:[%s2099_s1 + $0x18] sm:$0xff]  ;;  %v104_v17 = vld [vmem:[%s2099_s1 + $0x10] sm:$0xff]  ;;  %v107_v18 = vld [vmem:[%s2099_s1 + $0x28] sm:$0xff] }
  0x14   :  { %114 = vperm.xlu1 %1623, %v103_v3   ;;  %58 = vperm.xlu0 %1622, %v47_v4   ;;  %v106_v19 = vld [vmem:[%s2099_s1 + $0x20] sm:$0xff]  ;;  %v109_v20 = vld [vmem:[%s2099_s1 + $0x38] sm:$0xff]  ;;  %v108_v21 = vld [vmem:[%s2099_s1 + $0x30] sm:$0xff] }
  0x15   :  { %1421 = vmatprep.subr.mxu1 %v158_v10  ;;  %1406 = vmatpush3.msra.mxu0 %v160_v9  ;;  %v1811_v30 = vld [vmem:[%s2102_s4 + $0x38] sm:$0xff]  ;;  %v1820_v33 = vld [vmem:[%s2102_s4 + $0x30] sm:$0xff]  ;;  %v1834_v38 = vld [vmem:[%s2102_s4 + $0x28] sm:$0xff] }
  0x16   :  { %1422 = vmatpush3.msra.mxu1 %v158_v10  ;;  %1473 = vmatprep.subr.mxu0 %v1688_v13  ;;  %v1843_v41 = vld [vmem:[%s2102_s4 + $0x20] sm:$0xff]  ;;  %v1856_v44 = vld [vmem:[%s2102_s4 + $0x18] sm:$0xff]  ;;  %v1866_v47 = vld [vmem:[%s2102_s4 + $0x10] sm:$0xff] }
  0x17   :  { %1435 = vmatprep.subr.mxu1 %v1688_v13  ;;  %v1878_v50 = vld [vmem:[%s2102_s4 + $0x8] sm:$0xff]  ;;  %v1888_v53 = vld [vmem:[%s2102_s4] sm:$0xff] }
  0x18   :  { %64 = vperm.xlu1 %1623, %v49_v5   ;;  %61 = vperm.xlu0 %1622, %v48_v8   ;;  %v1278_v2 = vld [vmem:[%s2103_s5] ss:$0 sm:$0xff] }
  0x1c   :  { %70 = vperm.xlu1 %1623, %v51_v11   ;;  %67 = vperm.xlu0 %1622, %v50_v12  }
  0x20   :  { %76 = vperm.xlu1 %1623, %v53_v14   ;;  %73 = vperm.xlu0 %1622, %v52_v15  }
  0x24   :  { %120 = vperm.xlu1 %1623, %v105_v16   ;;  %117 = vperm.xlu0 %1622, %v104_v17  }
  0x28   :  { %126 = vperm.xlu1 %1623, %v107_v18   ;;  %123 = vperm.xlu0 %1622, %v106_v19  }
  0x2c   :  { %132 = vperm.xlu1 %1623, %v109_v20   ;;  %129 = vperm.xlu0 %1622, %v108_v21  }
  0x8b   :  { %v112_v24 = vpop.permute.xlu1 %111  ;;  %v56_v25 = vpop.permute.xlu0 %55 }
  0x8c   :  { %vm134_vm1 = vcmp.eq.s32.totalorder %v112_v24, %v1798_v23  ;;  %vm78_vm2 = vcmp.eq.s32.totalorder %v56_v25, %v1798_v23 }
  0x8d   :  { %v1246_v26 = vsel %vm78_vm2, 1.0, %v1688_v13  ;;  %v1254_v27 = vsel %vm134_vm1, 1.0, %v1688_v13 }
  0x8e   :  { %1423 = vmatprep.mubr.msk.f32.mxu1 %vm162_vm0, %v1246_v26  ;;  %1407 = vmatprep.mubr.msk.f32.mxu0 %vm162_vm0, %v1254_v27 }
  0x8f   :  { %v115_v28 = vpop.permute.xlu1 %114  ;;  %v59_v29 = vpop.permute.xlu0 %58 }
  0x90   :  { %vm135_vm3 = vcmp.eq.s32.totalorder %v115_v28, %v1798_v23  ;;  %vm79_vm4 = vcmp.eq.s32.totalorder %v59_v29, %v1798_v23 }
  0x91   :  { %v1255_v31 = vsel %vm135_vm3, 1.0, %v1688_v13  ;;  %v1247_v32 = vsel %vm79_vm4, 1.0, %v1688_v13 }
  0x92   :  { %1408 = vmatmul.mubr.msk.f32.vlgmr.msra.gmra.mxu0 %vm162_vm0, %v1255_v31  ;;  %1424 = vmatmul.mubr.msk.f32.vlgmr.msra.gmra.mxu1 %vm162_vm0, %v1247_v32 }
  0x93   :  { %v65_v34 = vpop.permute.xlu1 %64  ;;  %1436 = vmatpush3.msra.mxu1 %v1811_v30  ;;  %v62_v35 = vpop.permute.xlu0 %61  ;;  %1474 = vmatpush3.msra.mxu0 %v1811_v30 }
  0x94   :  { %vm81_vm5 = vcmp.eq.s32.totalorder %v65_v34, %v1798_v23  ;;  %vm80_vm6 = vcmp.eq.s32.totalorder %v62_v35, %v1798_v23  ;;  %1437 = vmatprep.subr.mxu1 %v1688_v13  ;;  %1475 = vmatprep.subr.mxu0 %v1688_v13 }
  0x95   :  { %v1249_v36 = vsel %vm81_vm5, 1.0, %v1688_v13  ;;  %v1248_v37 = vsel %vm80_vm6, 1.0, %v1688_v13  ;;  %1438 = vmatpush3.msra.mxu1 %v1820_v33  ;;  %1476 = vmatpush3.msra.mxu0 %v1820_v33 }
  0x96   :  { %1426 = vmatprep.mubr.msk.f32.mxu1 %vm162_vm0, %v1248_v37  ;;  %1439 = vmatprep.subr.mxu1 %v1688_v13 }
  0x97   :  { %v71_v39 = vpop.permute.xlu1 %70  ;;  %1427 = vmatmul.mubr.msk.f32.gmra.mxu1 %vm162_vm0, %v1249_v36  ;;  %v68_v40 = vpop.permute.xlu0 %67  ;;  %1477 = vmatprep.subr.mxu0 %v1688_v13 }
  0x98   :  { %vm83_vm7 = vcmp.eq.s32.totalorder %v71_v39, %v1798_v23  ;;  %1440 = vmatpush3.msra.mxu1 %v1834_v38  ;;  %vm82_vm8 = vcmp.eq.s32.totalorder %v68_v40, %v1798_v23  ;;  %1478 = vmatpush3.msra.mxu0 %v1834_v38 }
  0x99   :  { %v1251_v42 = vsel %vm83_vm7, 1.0, %v1688_v13  ;;  %v1250_v43 = vsel %vm82_vm8, 1.0, %v1688_v13  ;;  %1441 = vmatprep.subr.mxu1 %v1688_v13  ;;  %1479 = vmatprep.subr.mxu0 %v1688_v13 }
  0x9a   :  { %1442 = vmatpush3.msra.mxu1 %v1843_v41  ;;  %1429 = vmatprep.mubr.msk.f32.mxu1 %vm162_vm0, %v1250_v43 }
  0x9b   :  { %1443 = vmatprep.subr.mxu1 %v1688_v13  ;;  %v77_v45 = vpop.permute.xlu1 %76  ;;  %1430 = vmatmul.mubr.msk.f32.gmra.mxu1 %vm162_vm0, %v1251_v42  ;;  %v74_v46 = vpop.permute.xlu0 %73 }
  0x9c   :  { %vm85_vm9 = vcmp.eq.s32.totalorder %v77_v45, %v1798_v23  ;;  %1444 = vmatpush3.msra.mxu1 %v1856_v44  ;;  %vm84_vm10 = vcmp.eq.s32.totalorder %v74_v46, %v1798_v23  ;;  %1480 = vmatpush3.msra.mxu0 %v1843_v41 }
  0x9d   :  { %v1253_v48 = vsel %vm85_vm9, 1.0, %v1688_v13  ;;  %v1252_v49 = vsel %vm84_vm10, 1.0, %v1688_v13  ;;  %1445 = vmatprep.subr.mxu1 %v1688_v13  ;;  %1481 = vmatprep.subr.mxu0 %v1688_v13 }
  0x9e   :  { %1446 = vmatpush3.msra.mxu1 %v1866_v47  ;;  %1432 = vmatprep.mubr.msk.f32.mxu1 %vm162_vm0, %v1252_v49 }
  0x9f   :  { %1447 = vmatprep.subr.mxu1 %v1688_v13  ;;  %v121_v51 = vpop.permute.xlu1 %120  ;;  %1433 = vmatmul.mubr.msk.f32.gmra.mxu1 %vm162_vm0, %v1253_v48  ;;  %v118_v52 = vpop.permute.xlu0 %117 }
  0xa0   :  { %vm137_vm11 = vcmp.eq.s32.totalorder %v121_v51, %v1798_v23  ;;  %1448 = vmatpush3.msra.mxu1 %v1878_v50  ;;  %vm136_vm12 = vcmp.eq.s32.totalorder %v118_v52, %v1798_v23  ;;  %1451 = vmatprep.mubr.msk.f32.mxu1 %vm1689_vm13, %v1688_v13 }
  0xa1   :  { %v1257_v54 = vsel %vm137_vm11, 1.0, %v1688_v13  ;;  %v1256_v55 = vsel %vm136_vm12, 1.0, %v1688_v13  ;;  %1449 = vmatprep.subr.mxu1 %v1688_v13  ;;  %1482 = vmatpush3.msra.mxu0 %v1856_v44 }
  0xa2   :  { %1450 = vmatpush3.msra.mxu1 %v1888_v53  ;;  %1410 = vmatprep.mubr.msk.f32.mxu0 %vm162_vm0, %v1256_v55 }
  0xa3   :  { %v127_v56 = vpop.permute.xlu1 %126  ;;  %1411 = vmatmul.mubr.msk.f32.gmra.mxu0 %vm162_vm0, %v1257_v54  ;;  %1452 = vmatmul.mubr.f32.vlgmr.msra.gmra.mxu1 %v1688_v13  ;;  %v124_v57 = vpop.permute.xlu0 %123 }
  0xa4   :  { %vm139_vm14 = vcmp.eq.s32.totalorder %v127_v56, %v1798_v23  ;;  %vm138_vm15 = vcmp.eq.s32.totalorder %v124_v57, %v1798_v23  ;;  %1454 = vmatprep.subr.mxu1 %v1688_v13  ;;  %1470 = vmatprep.mubr.msk.f32.mxu1 %vm1689_vm13, %v1688_v13 }
  0xa5   :  { %v1259_v58 = vsel %vm139_vm14, 1.0, %v1688_v13  ;;  %v1258_v59 = vsel %vm138_vm15, 1.0, %v1688_v13  ;;  %1455 = vmatpush3.msra.mxu1 %v1811_v30  ;;  %1483 = vmatprep.subr.mxu0 %v1688_v13 }
  0xa6   :  { %1413 = vmatprep.mubr.msk.f32.mxu0 %vm162_vm0, %v1258_v59  ;;  %1456 = vmatprep.subr.mxu1 %v1688_v13 }
  0xa7   :  { %v133_v60 = vpop.permute.xlu1 %132  ;;  %1414 = vmatmul.mubr.msk.f32.gmra.mxu0 %vm162_vm0, %v1259_v58  ;;  %v130_v61 = vpop.permute.xlu0 %129  ;;  %1457 = vmatpush3.msra.mxu1 %v1820_v33 }
  0xa8   :  { %vm141_vm1 = vcmp.eq.s32.totalorder %v133_v60, %v1798_v23  ;;  %vm140_vm2 = vcmp.eq.s32.totalorder %v130_v61, %v1798_v23  ;;  %1458 = vmatprep.subr.mxu1 %v1688_v13  ;;  %1484 = vmatpush3.msra.mxu0 %v1866_v47 }
  0xa9   :  { %v1261_v62 = vsel %vm141_vm1, 1.0, %v1688_v13  ;;  %v1260_v63 = vsel %vm140_vm2, 1.0, %v1688_v13  ;;  %1459 = vmatpush3.msra.mxu1 %v1834_v38  ;;  %1485 = vmatprep.subr.mxu0 %v1688_v13 }
  0xaa   :  { %1416 = vmatprep.mubr.msk.f32.mxu0 %vm162_vm0, %v1260_v63  ;;  %1460 = vmatprep.subr.mxu1 %v1688_v13 }
  0xab   :  { %1417 = vmatmul.mubr.msk.f32.gmra.mxu0 %vm162_vm0, %v1261_v62  ;;  %1461 = vmatpush3.msra.mxu1 %v1843_v41  ;;  %vm436_vm0 = vcmask 523264  }
  0xac   :  { %1462 = vmatprep.subr.mxu1 %v1688_v13  ;;  %1486 = vmatpush3.msra.mxu0 %v1878_v50 }
  0xad   :  { %1463 = vmatpush3.msra.mxu1 %v1856_v44  ;;  %1487 = vmatprep.subr.mxu0 %v1688_v13 }
  0xae   :  { %1464 = vmatprep.subr.mxu1 %v1688_v13  ;;  %1488 = vmatpush3.msra.mxu0 %v1888_v53 }
  0xaf   :  { %1465 = vmatpush3.msra.mxu1 %v1866_v47  ;;  %1489 = vmatprep.mubr.msk.f32.mxu0 %vm1689_vm13, %v1688_v13 }
  0xb0   :  { %1466 = vmatprep.subr.mxu1 %v1688_v13  ;;  %1511 = vmatprep.subr.mxu0 %v1688_v13 }
  0xb1   :  { %1467 = vmatpush3.msra.mxu1 %v1878_v50 }
  0xb2   :  { %1468 = vmatprep.subr.mxu1 %v1688_v13 }
  0xb3   :  { %1469 = vmatpush3.msra.mxu1 %v1888_v53 }
  0xb4   :  { %1492 = vmatprep.subr.mxu1 %v1688_v13 }
 0x152   :  { %v1409_v0 = vpop.f32.mrf.mxu0  ;;  %v1425_v1 = vpop.f32.mrf.mxu1 }
 0x153   :  { %v388_v3 = vadd.f32 %v1425_v1, %v1409_v0 }
 0x154   :  { %v253_v4 = vpop.f32.mrf.mxu0  ;;  %v382_v5 = vpop.f32.mrf.mxu1 }
 0x155   :  { %v429_v6 = vadd.f32 %v1278_v2, %v388_v3  ;;  %v383_v7 = vadd.f32 %v382_v5, %v253_v4  ;;  %v1080_v4 = vld [vmem:[%s2104_s6 + $0x18] sm:$0xff]  ;;  %v1079_v5 = vld [vmem:[%s2104_s6 + $0x10] sm:$0xff] }
 0x157   :  { %438 = vst.msk [vmem:[#allocation2 + $0x8] sm:$0xff] %vm436_vm0, %v429_v6  ;;  %v428_v8 = vadd.f32 %v1278_v2, %v383_v7  ;;  %v1428_v9 = vpop.f32.mrf.mxu1  ;;  %v1078_v6 = vld [vmem:[%s2104_s6 + $0x8] sm:$0xff]  ;;  %v1077_v7 = vld [vmem:[%s2104_s6] sm:$0xff] }
 0x159   :  { %437 = vst.msk [vmem:[#allocation2] sm:$0xff] %vm436_vm0, %v428_v8  ;;  %v392_v10 = vpop.f32.mrf.mxu1 }
 0x15b   :  { %v1431_v11 = vpop.f32.mrf.mxu1 }
 0x15d   :  { %v402_v12 = vpop.f32.mrf.mxu1 }
 0x15e   :  { %v530_v43 = vld [vmem:[#allocation2 + $0x8] sm:$0xff] }
 0x15f   :  { %v1434_v14 = vpop.f32.mrf.mxu1 }
 0x160   :  { %v453_v17 = vld [vmem:[#allocation2] sm:$0xff] }
 0x161   :  { %v412_v15 = vpop.f32.mrf.mxu1 }
 0x163   :  { %v1412_v16 = vpop.f32.mrf.mxu0  ;;  %v523_v18 = vpop.f32.mrf.mxu1 }
 0x164   :  { %v398_v19 = vadd.f32 %v1428_v9, %v1412_v16  ;;  %v527_v20 = vadd.f32 %v523_v18, %v453_v17  ;;  %v1286_v18 = vld [vmem:[%s2105_s7] ss:$0 sm:$0xff]  ;;  %s1690_s7 = smov [#allocation6]  }
 0x165   :  { %v263_v21 = vpop.f32.mrf.mxu0  ;;  %v1453_v22 = vpop.f32.mrf.mxu1  ;;  %s1234_s11 = sshll.u32 %s1690_s7, 4  ;;  %s1235_s11 = int_to_ptr.vmem [resolvable:$true] %s1234_s11 }
 0x166   :  { %v431_v23 = vadd.f32 %v1278_v2, %v398_v19  ;;  %1624 = vtanh.f32 %v527_v20  ;;  %v393_v24 = vadd.f32 %v392_v10, %v263_v21  ;;  %s1660_s12 = scalar_lea.vmem %s1235_s11, 1024  ;;  %p1665_p6 = scmp.lt.s32.totalorder %s1235_s11, %s1235_s11 }
 0x167   :  { %v1415_v25 = vpop.f32.mrf.mxu0  ;;  %p1661_p5 = scmp.ne.s32.totalorder %s1235_s11, %s1660_s12  ;;  %p1666_p7 = scmp.lt.s32.totalorder %s1660_s12, %s1660_s12 }
 0x168   :  { %440 = vst.msk [vmem:[#allocation2 + $0x18] sm:$0xff] %vm436_vm0, %v431_v23  ;;  %v430_v26 = vadd.f32 %v1278_v2, %v393_v24  ;;  %v408_v27 = vadd.f32 %v1431_v11, %v1415_v25 }
 0x169   :  { %v273_v28 = vpop.f32.mrf.mxu0  ;;  %p1667_p8 = por %p1666_p7, %p1665_p6 }
 0x16a   :  { %439 = vst.msk [vmem:[#allocation2 + $0x10] sm:$0xff] %vm436_vm0, %v430_v26  ;;  %v433_v29 = vadd.f32 %v1278_v2, %v408_v27  ;;  %v403_v31 = vadd.f32 %v402_v12, %v273_v28 }
 0x16b   :  { %v1418_v32 = vpop.f32.mrf.mxu0  ;;  %p1668_p9 = pnand %p1667_p8, %p1661_p5 }
 0x16c   :  { %442 = vst.msk [vmem:[#allocation2 + $0x28] sm:$0xff] %vm436_vm0, %v433_v29  ;;  %v432_v34 = vadd.f32 %v1278_v2, %v403_v31  ;;  %v418_v35 = vadd.f32 %v1434_v14, %v1418_v32 }
 0x16d   :  { %v283_v36 = vpop.f32.mrf.mxu0 }
 0x16e   :  { %441 = vst.msk [vmem:[#allocation2 + $0x20] sm:$0xff] %vm436_vm0, %v432_v34  ;;  %v435_v37 = vadd.f32 %v1278_v2, %v418_v35  ;;  %v413_v39 = vadd.f32 %v412_v15, %v283_v36 }
 0x16f   :  { %v684_v57 = vld [vmem:[#allocation2 + $0x18] sm:$0xff] }
 0x170   :  { %444 = vst.msk [vmem:[#allocation2 + $0x38] sm:$0xff] %vm436_vm0, %v435_v37  ;;  %v434_v40 = vadd.f32 %v1278_v2, %v413_v39 }
 0x171   :  { %v607_v51 = vld [vmem:[#allocation2 + $0x10] sm:$0xff] }
 0x172   :  { %443 = vst.msk [vmem:[#allocation2 + $0x30] sm:$0xff] %vm436_vm0, %v434_v40 }
 0x173   :  { %v1625_v42 = vpop.eup %1624 }
 0x174   :  { %529 = vst.msk [vmem:[#allocation2] sm:$0xff] %vm436_vm0, %v1625_v42  ;;  %1471 = vmatmul.mubr.msk.f32.vlgmr.msra.gmra.mxu1 %vm436_vm0, %v1625_v42 }
 0x175   :  { %1493 = vmatpush3.msra.mxu1 %v1811_v30  ;;  %1508 = vmatprep.mubr.msk.f32.mxu1 %vm1689_vm13, %v1688_v13  ;;  %v761_v62 = vld [vmem:[#allocation2 + $0x20] sm:$0xff] }
 0x176   :  { %1494 = vmatprep.subr.mxu1 %v1688_v13 }
 0x177   :  { %1495 = vmatpush3.msra.mxu1 %v1820_v33  ;;  %v992_v35 = vld [vmem:[#allocation2 + $0x38] sm:$0xff] }
 0x178   :  { %1496 = vmatprep.subr.mxu1 %v1688_v13 }
 0x179   :  { %1497 = vmatpush3.msra.mxu1 %v1834_v38  ;;  %v915_v14 = vld [vmem:[#allocation2 + $0x30] sm:$0xff] }
 0x17a   :  { %1498 = vmatprep.subr.mxu1 %v1688_v13 }
 0x17b   :  { %1499 = vmatpush3.msra.mxu1 %v1843_v41 }
 0x17c   :  { %1500 = vmatprep.subr.mxu1 %v1688_v13 }
 0x17d   :  { %1501 = vmatpush3.msra.mxu1 %v1856_v44 }
 0x17e   :  { %1502 = vmatprep.subr.mxu1 %v1688_v13 }
 0x17f   :  { %1503 = vmatpush3.msra.mxu1 %v1866_v47 }
 0x180   :  { %1504 = vmatprep.subr.mxu1 %v1688_v13 }
 0x181   :  { %1505 = vmatpush3.msra.mxu1 %v1878_v50 }
 0x182   :  { %1506 = vmatprep.subr.mxu1 %v1688_v13 }
 0x183   :  { %1507 = vmatpush3.msra.mxu1 %v1888_v53 }
 0x184   :  { %1530 = vmatprep.subr.mxu1 %v1688_v13 }
 0x234   :  { %v600_v45 = vpop.f32.mrf.mxu1 }
 0x235   :  { %v604_v46 = vadd.f32 %v600_v45, %v530_v43 }
 0x236   :  { %v1472_v48 = vpop.f32.mrf.mxu1 }
 0x237   :  { %1626 = vtanh.f32 %v604_v46 }
 0x244   :  { %v1627_v49 = vpop.eup %1626 }
 0x245   :  { %606 = vst.msk [vmem:[#allocation2 + $0x8] sm:$0xff] %vm436_vm0, %v1627_v49  ;;  %1490 = vmatmul.mubr.msk.f32.vlgmr.msra.gmra.mxu0 %vm436_vm0, %v1627_v49 }
 0x246   :  { %1512 = vmatpush3.msra.mxu0 %v1811_v30  ;;  %1527 = vmatprep.mubr.msk.f32.mxu0 %vm1689_vm13, %v1688_v13 }
 0x247   :  { %1513 = vmatprep.subr.mxu0 %v1688_v13 }
 0x248   :  { %1514 = vmatpush3.msra.mxu0 %v1820_v33 }
 0x249   :  { %1515 = vmatprep.subr.mxu0 %v1688_v13 }
 0x24a   :  { %1516 = vmatpush3.msra.mxu0 %v1834_v38 }
 0x24b   :  { %1517 = vmatprep.subr.mxu0 %v1688_v13 }
 0x24c   :  { %1518 = vmatpush3.msra.mxu0 %v1843_v41  ;;  %v1070_v8 = vld [vmem:[#allocation2 + $0x8] sm:$0xff] }
 0x24d   :  { %1519 = vmatprep.subr.mxu0 %v1688_v13 }
 0x24e   :  { %1520 = vmatpush3.msra.mxu0 %v1856_v44 }
 0x24f   :  { %1521 = vmatprep.subr.mxu0 %v1688_v13 }
 0x250   :  { %1522 = vmatpush3.msra.mxu0 %v1866_v47 }
 0x251   :  { %1523 = vmatprep.subr.mxu0 %v1688_v13 }
 0x252   :  { %1524 = vmatpush3.msra.mxu0 %v1878_v50 }
 0x253   :  { %1525 = vmatprep.subr.mxu0 %v1688_v13 }
 0x254   :  { %1526 = vmatpush3.msra.mxu0 %v1888_v53 }
 0x255   :  { %1549 = vmatprep.subr.mxu0 %v1688_v13 }
 0x305   :  { %v677_v52 = vpop.f32.mrf.mxu0 }
 0x306   :  { %v681_v54 = vadd.f32 %v677_v52, %v607_v51 }
 0x307   :  { %v1491_v55 = vpop.f32.mrf.mxu0 }
 0x308   :  { %1628 = vtanh.f32 %v681_v54 }
 0x315   :  { %v1629_v56 = vpop.eup %1628 }
 0x316   :  { %683 = vst.msk [vmem:[#allocation2 + $0x10] sm:$0xff] %vm436_vm0, %v1629_v56  ;;  %1509 = vmatmul.mubr.msk.f32.vlgmr.msra.gmra.mxu1 %vm436_vm0, %v1629_v56 }
 0x317   :  { %1531 = vmatpush3.msra.mxu1 %v1811_v30  ;;  %1546 = vmatprep.mubr.msk.f32.mxu1 %vm1689_vm13, %v1688_v13 }
 0x318   :  { %1532 = vmatprep.subr.mxu1 %v1688_v13 }
 0x319   :  { %1533 = vmatpush3.msra.mxu1 %v1820_v33 }
 0x31a   :  { %1534 = vmatprep.subr.mxu1 %v1688_v13 }
 0x31b   :  { %1535 = vmatpush3.msra.mxu1 %v1834_v38 }
 0x31c   :  { %1536 = vmatprep.subr.mxu1 %v1688_v13 }
 0x31d   :  { %1537 = vmatpush3.msra.mxu1 %v1843_v41  ;;  %v1071_v9 = vld [vmem:[#allocation2 + $0x10] sm:$0xff] }
 0x31e   :  { %1538 = vmatprep.subr.mxu1 %v1688_v13 }
 0x31f   :  { %1539 = vmatpush3.msra.mxu1 %v1856_v44 }
 0x320   :  { %1540 = vmatprep.subr.mxu1 %v1688_v13 }
 0x321   :  { %1541 = vmatpush3.msra.mxu1 %v1866_v47 }
 0x322   :  { %1542 = vmatprep.subr.mxu1 %v1688_v13 }
 0x323   :  { %1543 = vmatpush3.msra.mxu1 %v1878_v50 }
 0x324   :  { %1544 = vmatprep.subr.mxu1 %v1688_v13 }
 0x325   :  { %1545 = vmatpush3.msra.mxu1 %v1888_v53 }
 0x326   :  { %1568 = vmatprep.subr.mxu1 %v1688_v13 }
 0x3d6   :  { %v754_v58 = vpop.f32.mrf.mxu1 }
 0x3d7   :  { %v758_v59 = vadd.f32 %v754_v58, %v684_v57 }
 0x3d8   :  { %v1510_v60 = vpop.f32.mrf.mxu1 }
 0x3d9   :  { %1630 = vtanh.f32 %v758_v59 }
 0x3e6   :  { %v1631_v61 = vpop.eup %1630 }
 0x3e7   :  { %760 = vst.msk [vmem:[#allocation2 + $0x18] sm:$0xff] %vm436_vm0, %v1631_v61  ;;  %1528 = vmatmul.mubr.msk.f32.vlgmr.msra.gmra.mxu0 %vm436_vm0, %v1631_v61 }
 0x3e8   :  { %1550 = vmatpush3.msra.mxu0 %v1811_v30  ;;  %1565 = vmatprep.mubr.msk.f32.mxu0 %vm1689_vm13, %v1688_v13 }
 0x3e9   :  { %1551 = vmatprep.subr.mxu0 %v1688_v13 }
 0x3ea   :  { %1552 = vmatpush3.msra.mxu0 %v1820_v33 }
 0x3eb   :  { %1553 = vmatprep.subr.mxu0 %v1688_v13 }
 0x3ec   :  { %1554 = vmatpush3.msra.mxu0 %v1834_v38 }
 0x3ed   :  { %1555 = vmatprep.subr.mxu0 %v1688_v13 }
 0x3ee   :  { %1556 = vmatpush3.msra.mxu0 %v1843_v41  ;;  %v1072_v10 = vld [vmem:[#allocation2 + $0x18] sm:$0xff] }
 0x3ef   :  { %1557 = vmatprep.subr.mxu0 %v1688_v13 }
 0x3f0   :  { %1558 = vmatpush3.msra.mxu0 %v1856_v44 }
 0x3f1   :  { %1559 = vmatprep.subr.mxu0 %v1688_v13 }
 0x3f2   :  { %1560 = vmatpush3.msra.mxu0 %v1866_v47 }
 0x3f3   :  { %1561 = vmatprep.subr.mxu0 %v1688_v13 }
 0x3f4   :  { %1562 = vmatpush3.msra.mxu0 %v1878_v50 }
 0x3f5   :  { %1563 = vmatprep.subr.mxu0 %v1688_v13 }
 0x3f6   :  { %1564 = vmatpush3.msra.mxu0 %v1888_v53 }
 0x4a7   :  { %v831_v63 = vpop.f32.mrf.mxu0 }
 0x4a8   :  { %v835_v0 = vadd.f32 %v831_v63, %v761_v62 }
 0x4a9   :  { %v1529_v1 = vpop.f32.mrf.mxu0 }
 0x4aa   :  { %1632 = vtanh.f32 %v835_v0 }
 0x4b7   :  { %v1633_v2 = vpop.eup %1632 }
 0x4b8   :  { %837 = vst.msk [vmem:[#allocation2 + $0x20] sm:$0xff] %vm436_vm0, %v1633_v2  ;;  %1547 = vmatmul.mubr.msk.f32.vlgmr.msra.gmra.mxu1 %vm436_vm0, %v1633_v2 }
 0x4b9   :  { %1569 = vmatpush3.msra.mxu1 %v1811_v30  ;;  %1584 = vmatprep.mubr.msk.f32.mxu1 %vm1689_vm13, %v1688_v13  ;;  %v1084_v30 = vld [vmem:[%s2104_s6 + $0x38] sm:$0xff] }
 0x4ba   :  { %1570 = vmatprep.subr.mxu1 %v1688_v13  ;;  %1587 = vmatprep.subr.mxu0 %v1084_v30 }
 0x4bb   :  { %1571 = vmatpush3.msra.mxu1 %v1820_v33  ;;  %v838_v33 = vld [vmem:[#allocation2 + $0x28] sm:$0xff] }
 0x4bc   :  { %1572 = vmatprep.subr.mxu1 %v1688_v13 }
 0x4bd   :  { %1573 = vmatpush3.msra.mxu1 %v1834_v38 }
 0x4be   :  { %1574 = vmatprep.subr.mxu1 %v1688_v13 }
 0x4bf   :  { %1575 = vmatpush3.msra.mxu1 %v1843_v41  ;;  %v1073_v11 = vld [vmem:[#allocation2 + $0x20] sm:$0xff] }
 0x4c0   :  { %1576 = vmatprep.subr.mxu1 %v1688_v13 }
 0x4c1   :  { %1577 = vmatpush3.msra.mxu1 %v1856_v44 }
 0x4c2   :  { %1578 = vmatprep.subr.mxu1 %v1688_v13 }
 0x4c3   :  { %1579 = vmatpush3.msra.mxu1 %v1866_v47  ;;  %v1083_v47 = vld [vmem:[%s2104_s6 + $0x30] sm:$0xff] }
 0x4c4   :  { %1580 = vmatprep.subr.mxu1 %v1688_v13 }
 0x4c5   :  { %1581 = vmatpush3.msra.mxu1 %v1878_v50  ;;  %v1082_v50 = vld [vmem:[%s2104_s6 + $0x28] sm:$0xff] }
 0x4c6   :  { %1582 = vmatprep.subr.mxu1 %v1688_v13  ;;  %v1069_v13 = vld [vmem:[#allocation2] sm:$0xff] }
 0x4c7   :  { %1583 = vmatpush3.msra.mxu1 %v1888_v53  ;;  %v1081_v53 = vld [vmem:[%s2104_s6 + $0x20] sm:$0xff] }
 0x578   :  { %v908_v38 = vpop.f32.mrf.mxu1 }
 0x579   :  { %v912_v41 = vadd.f32 %v908_v38, %v838_v33 }
 0x57a   :  { %v1548_v44 = vpop.f32.mrf.mxu1 }
 0x57b   :  { %1634 = vtanh.f32 %v912_v41 }
 0x588   :  { %v1635_v3 = vpop.eup %1634 }
 0x589   :  { %914 = vst.msk [vmem:[#allocation2 + $0x28] sm:$0xff] %vm436_vm0, %v1635_v3  ;;  %1566 = vmatmul.mubr.msk.f32.vlgmr.msra.gmra.mxu0 %vm436_vm0, %v1635_v3 }
 0x58a   :  { %1588 = vmatpush3.msra.mxu0 %v1084_v30  ;;  %1603 = vmatprep.mubr.msk.f32.mxu0 %vm436_vm0, %v1069_v13 }
 0x58b   :  { %1589 = vmatprep.subr.mxu0 %v1083_v47 }
 0x58c   :  { %1590 = vmatpush3.msra.mxu0 %v1083_v47 }
 0x58d   :  { %1591 = vmatprep.subr.mxu0 %v1082_v50 }
 0x58e   :  { %1592 = vmatpush3.msra.mxu0 %v1082_v50 }
 0x58f   :  { %1593 = vmatprep.subr.mxu0 %v1081_v53 }
 0x590   :  { %1594 = vmatpush3.msra.mxu0 %v1081_v53  ;;  %v1074_v12 = vld [vmem:[#allocation2 + $0x28] sm:$0xff] }
 0x591   :  { %1595 = vmatprep.subr.mxu0 %v1080_v4 }
 0x592   :  { %1596 = vmatpush3.msra.mxu0 %v1080_v4 }
 0x593   :  { %1597 = vmatprep.subr.mxu0 %v1079_v5 }
 0x594   :  { %1598 = vmatpush3.msra.mxu0 %v1079_v5 }
 0x595   :  { %1599 = vmatprep.subr.mxu0 %v1078_v6 }
 0x596   :  { %1600 = vmatpush3.msra.mxu0 %v1078_v6 }
 0x597   :  { %1601 = vmatprep.subr.mxu0 %v1077_v7 }
 0x598   :  { %1602 = vmatpush3.msra.mxu0 %v1077_v7 }
 0x599   :  { %1604 = vmatmul.mubr.msk.f32.vlgmr.msra.gmra.mxu0 %vm436_vm0, %v1070_v8 }
 0x59a   :  { %1606 = vmatprep.mubr.msk.f32.mxu0 %vm436_vm0, %v1071_v9 }
 0x59d   :  { %1607 = vmatmul.mubr.msk.f32.gmra.mxu0 %vm436_vm0, %v1072_v10 }
 0x59e   :  { %1609 = vmatprep.mubr.msk.f32.mxu0 %vm436_vm0, %v1073_v11 }
 0x5a1   :  { %1610 = vmatmul.mubr.msk.f32.gmra.mxu0 %vm436_vm0, %v1074_v12 }
 0x649   :  { %v985_v15 = vpop.f32.mrf.mxu0 }
 0x64a   :  { %v989_v16 = vadd.f32 %v985_v15, %v915_v14 }
 0x64b   :  { %v1567_v17 = vpop.f32.mrf.mxu0 }
 0x64c   :  { %1636 = vtanh.f32 %v989_v16 }
 0x659   :  { %v1637_v19 = vpop.eup %1636  ;;  %v1605_v20 = vpop.f32.mrf.mxu0 }
 0x65a   :  { %991 = vst.msk [vmem:[#allocation2 + $0x30] sm:$0xff] %vm436_vm0, %v1637_v19  ;;  %v1188_v21 = vadd.f32 %v1605_v20, %v1286_v18  ;;  %1585 = vmatmul.mubr.msk.f32.vlgmr.msra.gmra.mxu1 %vm436_vm0, %v1637_v19 }
 0x65b   :  { %v1182_v22 = vpop.f32.mrf.mxu0 }
 0x65c   :  { %1222 = vst [vmem:[#allocation6 + $0x8] sm:$0xff] %v1188_v21  ;;  %v1183_v23 = vadd.f32 %v1286_v18, %v1182_v22 }
 0x65d   :  { %v1608_v24 = vpop.f32.mrf.mxu0 }
 0x65e   :  { %1221 = vst [vmem:[#allocation6] sm:$0xff] %v1183_v23  ;;  %v1198_v25 = vadd.f32 %v1608_v24, %v1286_v18 }
 0x65f   :  { %v1192_v26 = vpop.f32.mrf.mxu0 }
 0x660   :  { %1224 = vst [vmem:[#allocation6 + $0x18] sm:$0xff] %v1198_v25  ;;  %v1193_v27 = vadd.f32 %v1286_v18, %v1192_v26 }
 0x661   :  { %v1611_v28 = vpop.f32.mrf.mxu0  ;;  %v1075_v29 = vld [vmem:[#allocation2 + $0x30] sm:$0xff] }
 0x662   :  { %1223 = vst [vmem:[#allocation6 + $0x10] sm:$0xff] %v1193_v27  ;;  %v1208_v31 = vadd.f32 %v1611_v28, %v1286_v18  ;;  %1612 = vmatprep.mubr.msk.f32.mxu0 %vm436_vm0, %v1075_v29 }
 0x663   :  { %v1202_v32 = vpop.f32.mrf.mxu0 }
 0x664   :  { %1226 = vst [vmem:[#allocation6 + $0x28] sm:$0xff] %v1208_v31  ;;  %v1203_v34 = vadd.f32 %v1286_v18, %v1202_v32 }
 0x666   :  { %1225 = vst [vmem:[#allocation6 + $0x20] sm:$0xff] %v1203_v34 }
 0x71a   :  { %v1062_v36 = vpop.f32.mrf.mxu1 }
 0x71b   :  { %v1066_v37 = vadd.f32 %v1062_v36, %v992_v35 }
 0x71c   :  { %v1586_v39 = vpop.f32.mrf.mxu1 }
 0x71d   :  { %1638 = vtanh.f32 %v1066_v37 }
 0x72a   :  { %v1639_v40 = vpop.eup %1638 }
 0x72b   :  { %1068 = vst.msk [vmem:[#allocation2 + $0x38] sm:$0xff] %vm436_vm0, %v1639_v40 }
 0x732   :  { %v1076_v42 = vld [vmem:[#allocation2 + $0x38] sm:$0xff] }
 0x733   :  { %1613 = vmatmul.mubr.msk.f32.gmra.mxu0 %vm436_vm0, %v1076_v42 }
 0x7f3   :  { %v1614_v43 = vpop.f32.mrf.mxu0 }
 0x7f4   :  { %v1218_v45 = vadd.f32 %v1614_v43, %v1286_v18 }
 0x7f5   :  { %v1212_v46 = vpop.f32.mrf.mxu0 }
 0x7f6   :  { %1228 = vst [vmem:[#allocation6 + $0x38] sm:$0xff] %v1218_v45  ;;  %v1213_v48 = vadd.f32 %v1286_v18, %v1212_v46 }
 0x7f8   :  { %1227 = vst [vmem:[#allocation6 + $0x30] sm:$0xff] %v1213_v48 }
 0x7f9   :  { %1671 = shalt.err (!%p1668_p9)
}
 0x7fa   :  { %1240 = dma.vmem_to_hbm [thread:$0]  %s1235_s11, 1024, %s2106_s8, [#allocation5], %s1685_s30, %s1685_s30, %s1686_s9  }
 0x7fb   :  { %1682 = dma.done.wait [#allocation5], 1024  }
 0x7fc   :  { %1683 = vsyncadd [#allocation5], 4294966272 }
 0x7fd   :  { %1244 = vsyncpa [#allocation4], 1 }
 0x7fe   :  { %1245 = vsyncpa [#allocation5], 1 }

</bundles_post_ra>
